<compile_context>
chip_gen: v5e
topology: v5e:2x2
jax: 0.10.0
libtpu: 0.0.40
codegen_flags: <defaults>
</compile_context>

<pallas_src>
import math
import functools

import jax
import jax.numpy as jnp
from jax.experimental import pallas as pl
from jax.experimental.pallas import tpu as pltpu


# --------------------------------------------------------------------------- helpers
def _round_up(x, m):
    return ((x + m - 1) // m) * m


def _plan_dim(dim, align, target):
    """Pick (tile, padded_dim) for one matmul axis.

    Small dims use a single full-extent block (no padding and no (8,128) divisibility
    requirement).  Large dims use the target tile (a multiple of `align`) and the axis
    is padded up to a tile multiple so the grid divides evenly.
    """
    if dim <= target:
        return dim, dim
    tile = max(align, (target // align) * align)
    return tile, _round_up(dim, tile)


# --------------------------------------------------------------------------- kernels
def _linear_kernel(x_ref, wt_ref, b_ref, o_ref, acc_ref):
    # grid = (M/tm, N/tn, K/tk); K (reduction) is the last, "arbitrary" axis.
    @pl.when(pl.program_id(2) == 0)
    def _():
        acc_ref[...] = jnp.zeros_like(acc_ref)

    # bf16 x bf16 -> f32 accumulate on the MXU.
    acc_ref[...] += jnp.dot(x_ref[...], wt_ref[...], preferred_element_type=jnp.float32)

    @pl.when(pl.program_id(2) == pl.num_programs(2) - 1)
    def _():
        o_ref[...] = (acc_ref[...] + b_ref[...]).astype(o_ref.dtype)


def _attn_kernel(y_ref, o_ref, *, seq_len, n_heads, d_head, scale, causal):
    # y_ref: (3L, E) bf16 — the in_proj output for one batch, re-viewed so that rows
    # [0,L) / [L,2L) / [2L,3L) are exactly q / k / v of the reference's
    # `.chunk(3, dim=1)` + view + transpose.  o_ref: (L, E) bf16, lane-dense slab.
    L = seq_len

    # Fold the softmax scale into q (L*E elementwise work instead of scaling (L,L)).
    q2 = (y_ref[0:L, :].astype(jnp.float32) * jnp.float32(scale)).astype(y_ref.dtype)
    k2 = y_ref[L:2 * L, :]              # (L, E) bf16
    v2 = y_ref[2 * L:3 * L, :]          # (L, E) bf16

    if causal:
        row = jax.lax.broadcasted_iota(jnp.int32, (L, L), 0)
        col = jax.lax.broadcasted_iota(jnp.int32, (L, L), 1)
        mask = col > row                # strict upper triangle (same as torch .triu(1))

    outs = []
    for h in range(n_heads):
        sl = slice(h * d_head, (h + 1) * d_head)
        q_h = q2[:, sl]                 # (L, dh)
        k_h = k2[:, sl]
        v_h = v2[:, sl]

        # (L, L) f32 scores on the MXU (contract last dim of both; no explicit k.T).
        s = jax.lax.dot_general(q_h, k_h, (((1,), (1,)), ((), ())),
                                preferred_element_type=jnp.float32)
        if causal:
            # Large finite negative: exact 0 after softmax, no NaN risk for masked rows.
            s = jnp.where(mask, jnp.float32(-1e30), s)

        # Numerically stable softmax in f32; divide on the EUP via approx reciprocal.
        s = s - jnp.max(s, axis=-1, keepdims=True)
        p = jnp.exp(s)
        denom = jnp.sum(p, axis=-1, keepdims=True)
        p = p * pl.reciprocal(denom, approx=True)

        o_h = jnp.dot(p.astype(v_h.dtype), v_h, preferred_element_type=jnp.float32)
        outs.append(o_h)

    # Single lane-dense (L, E) store (heads concatenated along lanes).
    o_ref[...] = jnp.concatenate(outs, axis=-1).astype(o_ref.dtype)


# --------------------------------------------------------------------------- wrappers
def pallas_linear(x2d, wt, b2, out_dtype, *, tm_target=256, tn_target=256, tk_target=512):
    """y = x2d @ wt + b2  with x2d:(M,K) bf16, wt:(K,N) bf16, b2:(1,N) f32 -> (M,N) out_dtype."""
    M, K = x2d.shape
    K2, N = wt.shape
    assert K2 == K and b2.shape == (1, N)

    tm, Mp = _plan_dim(M, 8, tm_target)
    tk, Kp = _plan_dim(K, 128, tk_target)
    tn, Np = _plan_dim(N, 128, tn_target)

    if (Mp, Kp) != (M, K):
        x2d = jnp.pad(x2d, ((0, Mp - M), (0, Kp - K)))
    if (Kp, Np) != (K, N):
        wt = jnp.pad(wt, ((0, Kp - K), (0, Np - N)))
    if Np != N:
        b2 = jnp.pad(b2, ((0, 0), (0, Np - N)))

    grid = (Mp // tm, Np // tn, Kp // tk)

    out = pl.pallas_call(
        _linear_kernel,
        out_shape=jax.ShapeDtypeStruct((Mp, Np), out_dtype),
        grid_spec=pltpu.PrefetchScalarGridSpec(
            num_scalar_prefetch=0,
            grid=grid,
            in_specs=[
                pl.BlockSpec((tm, tk), lambda i, j, k: (i, k)),
                pl.BlockSpec((tk, tn), lambda i, j, k: (k, j)),
                pl.BlockSpec((1, tn), lambda i, j, k: (0, j)),
            ],
            out_specs=pl.BlockSpec((tm, tn), lambda i, j, k: (i, j)),
            scratch_shapes=[pltpu.VMEM((tm, tn), jnp.float32)],
        ),
        compiler_params=pltpu.CompilerParams(
            dimension_semantics=("parallel", "parallel", "arbitrary"),
            vmem_limit_bytes=32 * 1024 * 1024,
        ),
    )(x2d, wt, b2)

    if (Mp, Np) != (M, N):
        out = out[:M, :N]
    return out


def pallas_attention(y3, n_heads, d_head, seq_len, causal):
    """y3: (B, 3L, E) bf16 projection view -> (B, L, E) bf16 attention output."""
    B, threeL, E = y3.shape
    assert threeL == 3 * seq_len and E == n_heads * d_head

    kernel = functools.partial(
        _attn_kernel,
        seq_len=seq_len,
        n_heads=n_heads,
        d_head=d_head,
        scale=1.0 / math.sqrt(d_head),
        causal=bool(causal),
    )
    return pl.pallas_call(
        kernel,
        out_shape=jax.ShapeDtypeStruct((B, seq_len, E), y3.dtype),
        grid_spec=pltpu.PrefetchScalarGridSpec(
            num_scalar_prefetch=0,
            grid=(B,),
            in_specs=[pl.BlockSpec((None, 3 * seq_len, E), lambda b: (b, 0, 0))],
            out_specs=pl.BlockSpec((None, seq_len, E), lambda b: (b, 0, 0)),
        ),
        compiler_params=pltpu.CompilerParams(
            dimension_semantics=("parallel",),
            vmem_limit_bytes=32 * 1024 * 1024,
        ),
    )(y3)


def prepare_params(params):
    """One-time weight prep: transpose to (K, N) and cast MXU operands to bf16."""
    w_in, b_in, w_out, b_out = params
    return (
        jnp.asarray(w_in).T.astype(jnp.bfloat16),               # (E, 3E)
        jnp.asarray(b_in).reshape(1, -1).astype(jnp.float32),    # (1, 3E)
        jnp.asarray(w_out).T.astype(jnp.bfloat16),               # (E, E)
        jnp.asarray(b_out).reshape(1, -1).astype(jnp.float32),   # (1, E)
    )


def self_attention_forward(x, prepared_params, n_heads, causal_mask=False):
    """Port of SelfAttention.forward (including the literal dim=1 chunk)."""
    w_in_t, b_in, w_out_t, b_out = prepared_params
    B, L, E = x.shape
    # Faithful to `.chunk(3, dim=1)` followed by `.view(B, L, H, dh)`:
    assert L % 3 == 0, "seq_length must be divisible by 3 (chunk(3, dim=1))"
    assert E % n_heads == 0
    d_head = E // n_heads

    xb = x.astype(jnp.bfloat16)

    # in_proj: (B*L, E) @ (E, 3E) + b -> bf16 (feeds attention directly).
    y = pallas_linear(xb.reshape(B * L, E), w_in_t, b_in, out_dtype=jnp.bfloat16)

    # (B*L, 3E) -> (B, 3L, E): pure row-major reinterpretation. Per batch, rows
    # [0,L)/[L,2L)/[2L,3L) are exactly the reference's q/k/v after chunk+view+transpose,
    # with head h occupying lanes [h*dh, (h+1)*dh). No HBM transposes needed.
    y3 = y.reshape(B, 3 * L, E)

    attn = pallas_attention(y3, n_heads, d_head, L, causal_mask)   # (B, L, E) bf16

    # out_proj: (B*L, E) @ (E, E) + b -> f32 final output.
    out = pallas_linear(attn.reshape(B * L, E), w_out_t, b_out, out_dtype=jnp.float32)
    return out.reshape(B, L, E)


# --------------------------------------------------------------------------- reference
def _reference_forward(x, params, n_heads, causal_mask=False):
    w_in, b_in, w_out, b_out = params
    B, L, E = x.shape
    d_head = E // n_heads
    y = x @ w_in.T + b_in
    Lc = L // 3
    q, k, v = y[:, :Lc, :], y[:, Lc:2 * Lc, :], y[:, 2 * Lc:, :]
    interim = (B, L, n_heads, d_head)
    q = q.reshape(interim).transpose(0, 2, 1, 3)
    k = k.reshape(interim).transpose(0, 2, 1, 3)
    v = v.reshape(interim).transpose(0, 2, 1, 3)
    s = jnp.einsum("bhqd,bhkd->bhqk", q, k)
    if causal_mask:
        Lq = s.shape[-1]
        mask = jnp.triu(jnp.ones((Lq, Lq), dtype=bool), 1)
        s = jnp.where(mask, -jnp.inf, s)
    s = s / math.sqrt(d_head)
    p = jax.nn.softmax(s, axis=-1)
    o = jnp.einsum("bhqk,bhkd->bhqd", p, v)
    o = o.transpose(0, 2, 1, 3).reshape(B, L, E)
    return o @ w_out.T + b_out


# --------------------------------------------------------------------------- main
if __name__ == "__main__":
    n_heads = 2
    d_embed = 32
    batch = 2
    seq = 6          # must be divisible by 3 (module's chunk(3, dim=1))

    key = jax.random.PRNGKey(0)
    kx, k1, k2, k3, k4 = jax.random.split(key, 5)

    bound_in = 1.0 / math.sqrt(d_embed)
    w_in = jax.random.uniform(k1, (3 * d_embed, d_embed), jnp.float32, -bound_in, bound_in)
    b_in = jax.random.uniform(k2, (3 * d_embed,), jnp.float32, -bound_in, bound_in)
    w_out = jax.random.uniform(k3, (d_embed, d_embed), jnp.float32, -bound_in, bound_in)
    b_out = jax.random.uniform(k4, (d_embed,), jnp.float32, -bound_in, bound_in)
    params = (w_in, b_in, w_out, b_out)
    prepared = prepare_params(params)   # transpose + bf16 cast once, outside the forward

    x = jax.random.normal(kx, (batch, seq, d_embed), jnp.float32)

    fwd = jax.jit(self_attention_forward, static_argnames=("n_heads", "causal_mask"))

    out = jax.block_until_ready(fwd(x, prepared, n_heads=n_heads, causal_mask=False))
    ref = _reference_forward(x, params, n_heads, causal_mask=False)
    assert out.shape == (batch, seq, d_embed)
    assert out.dtype == jnp.float32
    assert jnp.allclose(out, ref, atol=5e-2, rtol=5e-2), float(jnp.max(jnp.abs(out - ref)))

    out_c = jax.block_until_ready(fwd(x, prepared, n_heads=n_heads, causal_mask=True))
    ref_c = _reference_forward(x, params, n_heads, causal_mask=True)
    assert jnp.allclose(out_c, ref_c, atol=5e-2, rtol=5e-2), float(jnp.max(jnp.abs(out_c - ref_c)))

    print("KERNEL_OK")
</pallas_src>

<mosaic_0001>
module attributes {stable_mosaic.version = 11 : i64} {
  func.func @_linear_kernel(%arg0: i32, %arg1: i32, %arg2: i32, %arg3: memref<12x32xbf16, #tpu.memory_space<vmem>>, %arg4: memref<32x96xbf16, #tpu.memory_space<vmem>>, %arg5: memref<1x96xf32, #tpu.memory_space<vmem>>, %arg6: memref<12x96xbf16, #tpu.memory_space<vmem>>, %arg7: memref<12x96xf32, #tpu.memory_space<vmem>>) attributes {dimension_semantics = [#tpu.dimension_semantics<parallel>, #tpu.dimension_semantics<parallel>, #tpu.dimension_semantics<arbitrary>], iteration_bounds = array<i64: 1, 1, 1>, scalar_prefetch = 0 : i64, scratch_operands = 1 : i64, tpu.core_type = #tpu.core_type<tc>, window_params = [{transform_indices = @transform_0, window_bounds = array<i64: 12, 32>}, {transform_indices = @transform_1, window_bounds = array<i64: 32, 96>}, {transform_indices = @transform_2, window_bounds = array<i64: 1, 96>}, {transform_indices = @transform_3, window_bounds = array<i64: 12, 96>}]} {
    %c0_i32 = arith.constant 0 : i32
    %0 = arith.cmpi eq, %arg2, %c0_i32 : i32
    %1 = arith.extui %0 : i1 to i32
    %c0_i32_0 = arith.constant 0 : i32
    %2 = arith.cmpi ne, %1, %c0_i32_0 : i32
    scf.if %2 {
      %cst_10 = arith.constant 0.000000e+00 : f32
      %12 = vector.broadcast %cst_10 : f32 to vector<12x96xf32>
      %c0_11 = arith.constant 0 : index
      %c0_12 = arith.constant 0 : index
      %13 = vector.load %arg7[%c0_11, %c0_12] : memref<12x96xf32, #tpu.memory_space<vmem>>, vector<12x96xf32>
      tpu.vector_store %arg7[%c0_11, %c0_12], %12 {strides = array<i32>} : memref<12x96xf32, #tpu.memory_space<vmem>>, vector<12x96xf32>,
    } else {
    }
    %c0 = arith.constant 0 : index
    %c0_1 = arith.constant 0 : index
    %3 = vector.load %arg7[%c0, %c0_1] : memref<12x96xf32, #tpu.memory_space<vmem>>, vector<12x96xf32>
    %c0_2 = arith.constant 0 : index
    %c0_3 = arith.constant 0 : index
    %4 = vector.load %arg3[%c0_2, %c0_3] : memref<12x32xbf16, #tpu.memory_space<vmem>>, vector<12x32xbf16>
    %c0_4 = arith.constant 0 : index
    %c0_5 = arith.constant 0 : index
    %5 = vector.load %arg4[%c0_4, %c0_5] : memref<32x96xbf16, #tpu.memory_space<vmem>>, vector<32x96xbf16>
    %cst = arith.constant dense<0.000000e+00> : vector<12x96xf32>
    %6 = tpu.matmul %4, %5, %cst {dimension_numbers = #tpu.dot_dimension_numbers<[1], [0], [0], [1], [0, 0, 1, 1], [], []>} : vector<12x32xbf16>, vector<32x96xbf16>, vector<12x96xf32> -> vector<12x96xf32>
    %7 = arith.addf %3, %6 : vector<12x96xf32>
    %c0_6 = arith.constant 0 : index
    %c0_7 = arith.constant 0 : index
    %8 = vector.load %arg7[%c0_6, %c0_7] : memref<12x96xf32, #tpu.memory_space<vmem>>, vector<12x96xf32>
    tpu.vector_store %arg7[%c0_6, %c0_7], %7 {strides = array<i32>} : memref<12x96xf32, #tpu.memory_space<vmem>>, vector<12x96xf32>,
    %c0_i32_8 = arith.constant 0 : i32
    %9 = arith.cmpi eq, %arg2, %c0_i32_8 : i32
    %10 = arith.extui %9 : i1 to i32
    %c0_i32_9 = arith.constant 0 : i32
    %11 = arith.cmpi ne, %10, %c0_i32_9 : i32
    scf.if %11 {
      %c0_10 = arith.constant 0 : index
      %c0_11 = arith.constant 0 : index
      %12 = vector.load %arg7[%c0_10, %c0_11] : memref<12x96xf32, #tpu.memory_space<vmem>>, vector<12x96xf32>
      %c0_12 = arith.constant 0 : index
      %c0_13 = arith.constant 0 : index
      %13 = vector.load %arg5[%c0_12, %c0_13] : memref<1x96xf32, #tpu.memory_space<vmem>>, vector<1x96xf32>
      %14 = vector.broadcast %13 : vector<1x96xf32> to vector<12x96xf32>
      %15 = arith.addf %12, %14 : vector<12x96xf32>
      %16 = arith.truncf %15 : vector<12x96xf32> to vector<12x96xbf16>
      %c0_14 = arith.constant 0 : index
      %c0_15 = arith.constant 0 : index
      %17 = vector.load %arg6[%c0_14, %c0_15] : memref<12x96xbf16, #tpu.memory_space<vmem>>, vector<12x96xbf16>
      tpu.vector_store %arg6[%c0_14, %c0_15], %16 {strides = array<i32>} : memref<12x96xbf16, #tpu.memory_space<vmem>>, vector<12x96xbf16>,
    } else {
    }
    return
  }
  func.func @transform_0(%arg0: i32, %arg1: i32, %arg2: i32) -> (i32, i32) {
    %c0_i32 = arith.constant 0 : i32
    return %arg0, %arg2 : i32, i32
  }
  func.func @transform_1(%arg0: i32, %arg1: i32, %arg2: i32) -> (i32, i32) {
    %c0_i32 = arith.constant 0 : i32
    return %arg2, %arg1 : i32, i32
  }
  func.func @transform_2(%arg0: i32, %arg1: i32, %arg2: i32) -> (i32, i32) {
    %c0_i32 = arith.constant 0 : i32
    %c0_i32_0 = arith.constant 0 : i32
    return %c0_i32, %arg1 : i32, i32
  }
  func.func @transform_3(%arg0: i32, %arg1: i32, %arg2: i32) -> (i32, i32) {
    %c0_i32 = arith.constant 0 : i32
    return %arg0, %arg1 : i32, i32
  }
}

module attributes {stable_mosaic.version = 11 : i64} {
  func.func @_attn_kernel(%arg0: i32, %arg1: memref<1x18x32xbf16, #tpu.memory_space<vmem>>, %arg2: memref<1x6x32xbf16, #tpu.memory_space<vmem>>) attributes {dimension_semantics = [#tpu.dimension_semantics<parallel>], iteration_bounds = array<i64: 2>, scalar_prefetch = 0 : i64, scratch_operands = 0 : i64, tpu.core_type = #tpu.core_type<tc>, window_params = [{transform_indices = @transform_0, window_bounds = array<i64: 1, 18, 32>}, {transform_indices = @transform_1, window_bounds = array<i64: 1, 6, 32>}]} {
    %c0 = arith.constant 0 : index
    %c0_0 = arith.constant 0 : index
    %c0_1 = arith.constant 0 : index
    %0 = vector.load %arg1[%c0, %c0_0, %c0_1] : memref<1x18x32xbf16, #tpu.memory_space<vmem>>, vector<1x6x32xbf16>
    %1 = vector.shape_cast %0 : vector<1x6x32xbf16> to vector<6x32xbf16>
    %2 = arith.extf %1 : vector<6x32xbf16> to vector<6x32xf32>
    %cst = arith.constant 2.500000e-01 : f32
    %3 = vector.broadcast %cst : f32 to vector<6x32xf32>
    %4 = arith.mulf %2, %3 : vector<6x32xf32>
    %5 = arith.truncf %4 : vector<6x32xf32> to vector<6x32xbf16>
    %c0_2 = arith.constant 0 : index
    %c6 = arith.constant 6 : index
    %c0_3 = arith.constant 0 : index
    %6 = vector.load %arg1[%c0_2, %c6, %c0_3] : memref<1x18x32xbf16, #tpu.memory_space<vmem>>, vector<1x6x32xbf16>
    %7 = vector.shape_cast %6 : vector<1x6x32xbf16> to vector<6x32xbf16>
    %c0_4 = arith.constant 0 : index
    %c12 = arith.constant 12 : index
    %c0_5 = arith.constant 0 : index
    %8 = vector.load %arg1[%c0_4, %c12, %c0_5] : memref<1x18x32xbf16, #tpu.memory_space<vmem>>, vector<1x6x32xbf16>
    %9 = vector.shape_cast %8 : vector<1x6x32xbf16> to vector<6x32xbf16>
    %10 = vector.extract_strided_slice %5 {offsets = [0, 0], sizes = [6, 16], strides = [1, 1]} : vector<6x32xbf16> to vector<6x16xbf16>
    %11 = vector.extract_strided_slice %7 {offsets = [0, 0], sizes = [6, 16], strides = [1, 1]} : vector<6x32xbf16> to vector<6x16xbf16>
    %12 = vector.extract_strided_slice %9 {offsets = [0, 0], sizes = [6, 16], strides = [1, 1]} : vector<6x32xbf16> to vector<6x16xbf16>
    %cst_6 = arith.constant dense<0.000000e+00> : vector<6x6xf32>
    %13 = tpu.matmul %10, %11, %cst_6 {dimension_numbers = #tpu.dot_dimension_numbers<[1], [1], [0], [0], [0, 0, 1, 0], [], []>} : vector<6x16xbf16>, vector<6x16xbf16>, vector<6x6xf32> -> vector<6x6xf32>
    %cst_7 = arith.constant dense<0xFF800000> : vector<6xf32>
    %14 = vector.multi_reduction <maximumf>, %13, %cst_7 [1] : vector<6x6xf32> to vector<6xf32>
    %15 = vector.shape_cast %14 : vector<6xf32> to vector<6x1xf32>
    %16 = vector.broadcast %15 : vector<6x1xf32> to vector<6x6xf32>
    %17 = arith.subf %13, %16 : vector<6x6xf32>
    %18 = math.exp %17 : vector<6x6xf32>
    %cst_8 = arith.constant dense<0.000000e+00> : vector<6xf32>
    %19 = vector.multi_reduction <add>, %18, %cst_8 [1] : vector<6x6xf32> to vector<6xf32>
    %20 = vector.shape_cast %19 : vector<6xf32> to vector<6x1xf32>
    %21 = tpu.reciprocal %20 {approx = true} : vector<6x1xf32> -> vector<6x1xf32>
    %22 = vector.broadcast %21 : vector<6x1xf32> to vector<6x6xf32>
    %23 = arith.mulf %18, %22 : vector<6x6xf32>
    %24 = arith.truncf %23 : vector<6x6xf32> to vector<6x6xbf16>
    %cst_9 = arith.constant dense<0.000000e+00> : vector<6x16xf32>
    %25 = tpu.matmul %24, %12, %cst_9 {dimension_numbers = #tpu.dot_dimension_numbers<[1], [0], [0], [1], [0, 0, 1, 1], [], []>} : vector<6x6xbf16>, vector<6x16xbf16>, vector<6x16xf32> -> vector<6x16xf32>
    %26 = vector.extract_strided_slice %5 {offsets = [0, 16], sizes = [6, 16], strides = [1, 1]} : vector<6x32xbf16> to vector<6x16xbf16>
    %27 = vector.extract_strided_slice %7 {offsets = [0, 16], sizes = [6, 16], strides = [1, 1]} : vector<6x32xbf16> to vector<6x16xbf16>
    %28 = vector.extract_strided_slice %9 {offsets = [0, 16], sizes = [6, 16], strides = [1, 1]} : vector<6x32xbf16> to vector<6x16xbf16>
    %cst_10 = arith.constant dense<0.000000e+00> : vector<6x6xf32>
    %29 = tpu.matmul %26, %27, %cst_10 {dimension_numbers = #tpu.dot_dimension_numbers<[1], [1], [0], [0], [0, 0, 1, 0], [], []>} : vector<6x16xbf16>, vector<6x16xbf16>, vector<6x6xf32> -> vector<6x6xf32>
    %cst_11 = arith.constant dense<0xFF800000> : vector<6xf32>
    %30 = vector.multi_reduction <maximumf>, %29, %cst_11 [1] : vector<6x6xf32> to vector<6xf32>
    %31 = vector.shape_cast %30 : vector<6xf32> to vector<6x1xf32>
    %32 = vector.broadcast %31 : vector<6x1xf32> to vector<6x6xf32>
    %33 = arith.subf %29, %32 : vector<6x6xf32>
    %34 = math.exp %33 : vector<6x6xf32>
    %cst_12 = arith.constant dense<0.000000e+00> : vector<6xf32>
    %35 = vector.multi_reduction <add>, %34, %cst_12 [1] : vector<6x6xf32> to vector<6xf32>
    %36 = vector.shape_cast %35 : vector<6xf32> to vector<6x1xf32>
    %37 = tpu.reciprocal %36 {approx = true} : vector<6x1xf32> -> vector<6x1xf32>
    %38 = vector.broadcast %37 : vector<6x1xf32> to vector<6x6xf32>
    %39 = arith.mulf %34, %38 : vector<6x6xf32>
    %40 = arith.truncf %39 : vector<6x6xf32> to vector<6x6xbf16>
    %cst_13 = arith.constant dense<0.000000e+00> : vector<6x16xf32>
    %41 = tpu.matmul %40, %28, %cst_13 {dimension_numbers = #tpu.dot_dimension_numbers<[1], [0], [0], [1], [0, 0, 1, 1], [], []>} : vector<6x6xbf16>, vector<6x16xbf16>, vector<6x16xf32> -> vector<6x16xf32>
    %42 = tpu.concatenate %25, %41 in 1 : vector<6x16xf32>, vector<6x16xf32> -> vector<6x32xf32>
    %43 = arith.truncf %42 : vector<6x32xf32> to vector<6x32xbf16>
    %c0_14 = arith.constant 0 : index
    %c0_15 = arith.constant 0 : index
    %c0_16 = arith.constant 0 : index
    %44 = vector.load %arg2[%c0_14, %c0_15, %c0_16] : memref<1x6x32xbf16, #tpu.memory_space<vmem>>, vector<1x6x32xbf16>
    %45 = vector.shape_cast %44 : vector<1x6x32xbf16> to vector<6x32xbf16>
    %46 = vector.shape_cast %43 : vector<6x32xbf16> to vector<1x6x32xbf16>
    tpu.vector_store %arg2[%c0_14, %c0_15, %c0_16], %46 {strides = array<i32>} : memref<1x6x32xbf16, #tpu.memory_space<vmem>>, vector<1x6x32xbf16>,
    return
  }
  func.func @transform_0(%arg0: i32) -> (i32, i32, i32) {
    %c0_i32 = arith.constant 0 : i32
    %c0_i32_0 = arith.constant 0 : i32
    %c0_i32_1 = arith.constant 0 : i32
    return %arg0, %c0_i32, %c0_i32_0 : i32, i32, i32
  }
  func.func @transform_1(%arg0: i32) -> (i32, i32, i32) {
    %c0_i32 = arith.constant 0 : i32
    %c0_i32_0 = arith.constant 0 : i32
    %c0_i32_1 = arith.constant 0 : i32
    return %arg0, %c0_i32, %c0_i32_0 : i32, i32, i32
  }
}

module attributes {stable_mosaic.version = 11 : i64} {
  func.func @_linear_kernel(%arg0: i32, %arg1: i32, %arg2: i32, %arg3: memref<12x32xbf16, #tpu.memory_space<vmem>>, %arg4: memref<32x32xbf16, #tpu.memory_space<vmem>>, %arg5: memref<1x32xf32, #tpu.memory_space<vmem>>, %arg6: memref<12x32xf32, #tpu.memory_space<vmem>>, %arg7: memref<12x32xf32, #tpu.memory_space<vmem>>) attributes {dimension_semantics = [#tpu.dimension_semantics<parallel>, #tpu.dimension_semantics<parallel>, #tpu.dimension_semantics<arbitrary>], iteration_bounds = array<i64: 1, 1, 1>, scalar_prefetch = 0 : i64, scratch_operands = 1 : i64, tpu.core_type = #tpu.core_type<tc>, window_params = [{transform_indices = @transform_0, window_bounds = array<i64: 12, 32>}, {transform_indices = @transform_1, window_bounds = array<i64: 32, 32>}, {transform_indices = @transform_2, window_bounds = array<i64: 1, 32>}, {transform_indices = @transform_3, window_bounds = array<i64: 12, 32>}]} {
    %c0_i32 = arith.constant 0 : i32
    %0 = arith.cmpi eq, %arg2, %c0_i32 : i32
    %1 = arith.extui %0 : i1 to i32
    %c0_i32_0 = arith.constant 0 : i32
    %2 = arith.cmpi ne, %1, %c0_i32_0 : i32
    scf.if %2 {
      %cst_10 = arith.constant 0.000000e+00 : f32
      %12 = vector.broadcast %cst_10 : f32 to vector<12x32xf32>
      %c0_11 = arith.constant 0 : index
      %c0_12 = arith.constant 0 : index
      %13 = vector.load %arg7[%c0_11, %c0_12] : memref<12x32xf32, #tpu.memory_space<vmem>>, vector<12x32xf32>
      tpu.vector_store %arg7[%c0_11, %c0_12], %12 {strides = array<i32>} : memref<12x32xf32, #tpu.memory_space<vmem>>, vector<12x32xf32>,
    } else {
    }
    %c0 = arith.constant 0 : index
    %c0_1 = arith.constant 0 : index
    %3 = vector.load %arg7[%c0, %c0_1] : memref<12x32xf32, #tpu.memory_space<vmem>>, vector<12x32xf32>
    %c0_2 = arith.constant 0 : index
    %c0_3 = arith.constant 0 : index
    %4 = vector.load %arg3[%c0_2, %c0_3] : memref<12x32xbf16, #tpu.memory_space<vmem>>, vector<12x32xbf16>
    %c0_4 = arith.constant 0 : index
    %c0_5 = arith.constant 0 : index
    %5 = vector.load %arg4[%c0_4, %c0_5] : memref<32x32xbf16, #tpu.memory_space<vmem>>, vector<32x32xbf16>
    %cst = arith.constant dense<0.000000e+00> : vector<12x32xf32>
    %6 = tpu.matmul %4, %5, %cst {dimension_numbers = #tpu.dot_dimension_numbers<[1], [0], [0], [1], [0, 0, 1, 1], [], []>} : vector<12x32xbf16>, vector<32x32xbf16>, vector<12x32xf32> -> vector<12x32xf32>
    %7 = arith.addf %3, %6 : vector<12x32xf32>
    %c0_6 = arith.constant 0 : index
    %c0_7 = arith.constant 0 : index
    %8 = vector.load %arg7[%c0_6, %c0_7] : memref<12x32xf32, #tpu.memory_space<vmem>>, vector<12x32xf32>
    tpu.vector_store %arg7[%c0_6, %c0_7], %7 {strides = array<i32>} : memref<12x32xf32, #tpu.memory_space<vmem>>, vector<12x32xf32>,
    %c0_i32_8 = arith.constant 0 : i32
    %9 = arith.cmpi eq, %arg2, %c0_i32_8 : i32
    %10 = arith.extui %9 : i1 to i32
    %c0_i32_9 = arith.constant 0 : i32
    %11 = arith.cmpi ne, %10, %c0_i32_9 : i32
    scf.if %11 {
      %c0_10 = arith.constant 0 : index
      %c0_11 = arith.constant 0 : index
      %12 = vector.load %arg7[%c0_10, %c0_11] : memref<12x32xf32, #tpu.memory_space<vmem>>, vector<12x32xf32>
      %c0_12 = arith.constant 0 : index
      %c0_13 = arith.constant 0 : index
      %13 = vector.load %arg5[%c0_12, %c0_13] : memref<1x32xf32, #tpu.memory_space<vmem>>, vector<1x32xf32>
      %14 = vector.broadcast %13 : vector<1x32xf32> to vector<12x32xf32>
      %15 = arith.addf %12, %14 : vector<12x32xf32>
      %c0_14 = arith.constant 0 : index
      %c0_15 = arith.constant 0 : index
      %16 = vector.load %arg6[%c0_14, %c0_15] : memref<12x32xf32, #tpu.memory_space<vmem>>, vector<12x32xf32>
      tpu.vector_store %arg6[%c0_14, %c0_15], %15 {strides = array<i32>} : memref<12x32xf32, #tpu.memory_space<vmem>>, vector<12x32xf32>,
    } else {
    }
    return
  }
  func.func @transform_0(%arg0: i32, %arg1: i32, %arg2: i32) -> (i32, i32) {
    %c0_i32 = arith.constant 0 : i32
    return %arg0, %arg2 : i32, i32
  }
  func.func @transform_1(%arg0: i32, %arg1: i32, %arg2: i32) -> (i32, i32) {
    %c0_i32 = arith.constant 0 : i32
    return %arg2, %arg1 : i32, i32
  }
  func.func @transform_2(%arg0: i32, %arg1: i32, %arg2: i32) -> (i32, i32) {
    %c0_i32 = arith.constant 0 : i32
    %c0_i32_0 = arith.constant 0 : i32
    return %c0_i32, %arg1 : i32, i32
  }
  func.func @transform_3(%arg0: i32, %arg1: i32, %arg2: i32) -> (i32, i32) {
    %c0_i32 = arith.constant 0 : i32
    return %arg0, %arg1 : i32, i32
  }
}

</mosaic_0001>

<bundles_post_ra>
// kernel: self_attention_forward.4
= control target key start
LH: loop header
LB: loop body
LE: loop exit
PB: predicated region body
PF: predicated region fallthrough
CT: control target
= control target key end

     0   :  { %s372_s6 = smov 0   ;;  %s412_s0 = inlined_call_operand.vmem [shape: bf16[2,18,32], index: 0, kind: input, shape index: {}]   ;;  %s413_s1 = inlined_call_operand.vmem [shape: bf16[2,6,32], index: 1, kind: output, shape index: {}]  }
   0x1 LB: > { %s310_s7 = sadd.s32 4294967295, %s358_s6   ;;  %p314_p0 = scmp.ge.s32.totalorder %s358_s6, 1  ;;  %s358_s6 = sphi %s372_s6, %s11_s6  }
   0x2   : > { %p87_p1 = scmp.lt.s32.totalorder %s358_s6, 3 }
   0x4   : > { %p88_p2 = pnand %p314_p0, %p87_p1 }
   0x5   : > { %p106_p3 = scmp.lt.s32.totalorder (!%p88_p2), %s310_s7, 1  ;;  %s360_s12 = smov (!%p88_p2), 112  }
   0x6   : > { %91 = sbr.rel (%p88_p2) target bundleno = 783 (0x30f), region = 24  ;;  %s361_s13 = smov (!%p88_p2), 16  }
   0xb   : > { %s415_s7 = smov (!%p106_p3, %s310_s7), 1  ;;  %vm130_vm0 = vcmask 130048   ;;  %vm150_vm1 = vcmask 46080   ;;  %vm173_vm2 = vcmask 1042432   ;;  %vm169_vm3 = vcmask 48128  }
   0xc   : > { %s333_s8 = smul.u32 12, %s415_s7  ;;  %s316_s14 = sshll.u32 %s415_s7, 2  ;;  %vm255_vm4 = vcmask 256000  }
   0xd   : > { %s114_s17 = scalar_lea.vmem %s413_s1, %s316_s14 }
   0xe   : > { %s386_s11 = scalar_lea.vmem %s412_s0, %s333_s8 }
   0xf   : > { %v319_v0 = vld [vmem:[%s386_s11] sm:$0x8]  ;;  %v331_v1 = vld [vmem:[%s386_s11] sm:$0x30]  ;;  %v116_v2 = vld [vmem:[%s386_s11] sm:$0x7] }
  0x10   : > { %v320_v3 = vor.u32 %v331_v1, %v319_v0  ;;  %v117_v4 = vunpack.c.l.bf16 %v116_v2  ;;  %v324_v30 = vld [vmem:[%s386_s11 + $0x4] sm:$0xc]  ;;  %v332_v31 = vld [vmem:[%s386_s11 + $0x4] sm:$0x10] }
  0x11   : > { %v325_v32 = vor.u32 %v332_v31, %v324_v30 }
  0x12   : > { %v129_v5 = vrot.slane %v320_v3, 3  ;;  %v118_v6 = vmul.f32 0.25, %v117_v4 }
  0x13   : > { %v168_v33 = vrot.slane %v325_v32, 2 }
  0x14   : > { %195 = vrot.lane.b32.xlu0 %v129_v5, %s360_s12  ;;  %v119_v7 = vpack.c.bf16 %v118_v6, %v118_v6  ;;  %v135_v10 = vsel %vm130_vm0, %v129_v5, 0 }
  0x15   : > { %144 = vmatpush.bf16.xpose.msra.mxu0 %v135_v10  ;;  %v175_v34 = vsel %vm173_vm2, %v168_v33, 0 }
  0x16   : > { %v191_v8 = vunpack.c.l.b16 %v119_v7  ;;  %184 = vmatpush.bf16.msra.mxu1 %v175_v34 }
  0x18   : > { %v192_v9 = vpack.c.b16 %v191_v8, %v191_v8 }
  0x1c   : > { %193 = vrot.lane.b32.xlu0 %v192_v9, %s360_s12  ;;  %321 = vmatmul.msk.bf16.vlgmr.msra.gmra.mxu0 %vm130_vm0, %v119_v7 }
  0x86   : > { %v196_v11 = vpop.permute.xlu0 %195 }
  0x87   : > { %v201_v12 = vsel %vm130_vm0, %v196_v11, 0 }
  0x88   : > { %210 = vmatpush.bf16.xpose.msra.mxu2 %v201_v12 }
  0x8e   : > { %v194_v13 = vpop.permute.xlu0 %193 }
  0x8f   : > { %327 = vmatmul.msk.bf16.vlgmr.msra.gmra.mxu2 %vm130_vm0, %v194_v13 }
  0x99   : > { %v146_v14 = vpop.f32.mrf.mxu0 }
  0x9a   : > { %v151_v18 = vsel %vm150_vm1, %v146_v14, -inf }
  0xa1   : > { %v148_v15 = vpop.f32.mrf.mxu0 }
 0x112   : > { %v212_v16 = vpop.f32.mrf.mxu2 }
 0x113   : > { %v216_v17 = vsel %vm150_vm1, %v212_v16, -inf }
 0x114   : > { %217 = vmax.xlane.f32.xlu1 %v216_v17 }
 0x11a   : > { %v214_v19 = vpop.f32.mrf.mxu2 }
 0x11c   : > { %152 = vmax.xlane.f32.xlu1 %v151_v18 }
 0x187   : > { %v218_v20 = vpop.xlane.xlu1 %217 }
 0x188   : > { %v219_v21 = vsub.f32 %v212_v16, %v218_v20 }
 0x18a   : > { %v220_v22 = vmul.f32 1.442695, %v219_v21 }
 0x18c   : > { %344 = vpow2.f32 %v220_v22 }
 0x18f   : > { %v153_v23 = vpop.xlane.xlu1 %152 }
 0x190   : > { %v154_v24 = vsub.f32 %v146_v14, %v153_v23 }
 0x192   : > { %v345_v25 = vpop.eup %344  ;;  %v155_v26 = vmul.f32 1.442695, %v154_v24 }
 0x193   : > { %v222_v27 = vsel %vm150_vm1, %v345_v25, 0.0 }
 0x194   : > { %346 = vpow2.f32 %v155_v26  ;;  %223 = vadd.xlane.f32.xlu2 %v222_v27 }
 0x19a   : > { %v347_v28 = vpop.eup %346 }
 0x19b   : > { %v157_v29 = vsel %vm150_vm1, %v347_v28, 0.0 }
 0x19c   : > { %158 = vadd.xlane.f32.xlu0 %v157_v29 }
 0x1ac   : > { %228 = vrot.lane.b32.xlu2 %v168_v33, %s360_s12 }
 0x207   : > { %v224_v35 = vpop.xlane.xlu2 %223 }
 0x208   : > { %348 = vrcp.f32 %v224_v35 }
 0x20e   : > { %v349_v36 = vpop.eup %348 }
 0x20f   : > { %v229_v37 = vpop.permute.xlu2 %228  ;;  %v159_v38 = vpop.xlane.xlu0 %158  ;;  %v226_v39 = vmul.f32 %v349_v36, %v345_v25 }
 0x210   : > { %350 = vrcp.f32 %v159_v38  ;;  %v234_v40 = vsel %vm173_vm2, %v229_v37, 0 }
 0x211   : > { %243 = vmatpush.bf16.msra.mxu3 %v234_v40  ;;  %v227_v41 = vpack.c.bf16 %v226_v39, %v226_v39 }
 0x214   : > { %328 = vmatmul.msk.bf16.vlgmr.msra.gmra.mxu3 %vm169_vm3, %v227_v41 }
 0x216   : > { %v351_v42 = vpop.eup %350 }
 0x217   : > { %v161_v43 = vmul.f32 %v351_v42, %v347_v28 }
 0x219   : > { %v162_v44 = vpack.c.bf16 %v161_v43, %v161_v43 }
 0x21b   : > { %326 = vmatmul.msk.bf16.vlgmr.msra.gmra.mxu1 %vm169_vm3, %v162_v44 }
 0x297   : > { %v245_v45 = vpop.f32.mrf.mxu3 }
 0x298   : > { %250 = vrot.lane.b32.xlu1 %v245_v45, %s361_s13  ;;  %v186_v46 = vpop.f32.mrf.mxu1 }
 0x29f   : > { %v247_v47 = vpop.f32.mrf.mxu3 }
 0x2a0   : > { %v188_v48 = vpop.f32.mrf.mxu1 }
 0x30a   : > { %v251_v49 = vpop.permute.xlu1 %250 }
 0x30b   : > { %v253_v50 = vsel %vm130_vm0, %v186_v46, %v251_v49 }
 0x30c   : > { %v254_v51 = vpack.c.bf16 %v253_v50, %v253_v50 }
 0x30e   : > { %256 = vst.msk [vmem:[%s114_s17] sm:$0x7] %vm255_vm4, %v254_v51 }
 0x30f PF: > { %s11_s6 = sadd.s32 1, %s358_s6  }
 0x310   : > { %p8_p4 = scmp.ge.s32.totalorder %s11_s6, 4  }
 0x312   :  { %10 = sbr.rel (!%p8_p4) target bundleno = 1 (0x1), region = 54 }

// kernel: self_attention_forward.3
= control target key start
LH: loop header
LB: loop body
LE: loop exit
PB: predicated region body
PF: predicated region fallthrough
CT: control target
= control target key end

     0   :  { %vm19_vm0 = vcmask 785408   ;;  %v110_v1 = vmov 0.0   ;;  %vm48_vm1 = vcmask 261120   ;;  %vm21_vm2 = vcmask 781312   ;;  %s154_s1 = inlined_call_operand.vmem [shape: bf16[32,96], index: 1, kind: input, shape index: {}]   ;;  %s155_s0 = inlined_call_operand.vmem [shape: bf16[12,32], index: 0, kind: input, shape index: {}]   ;;  %s156_s2 = inlined_call_operand.vmem [shape: f32[1,96], index: 2, kind: input, shape index: {}]   ;;  %s157_s3 = inlined_call_operand.vmem [shape: bf16[12,96], index: 3, kind: output, shape index: {}]  }
   0x1   :  { %v107_v0 = vld [vmem:[%s154_s1 + $0x8] sm:$0xff]  ;;  %20 = vst.msk [vmem:[#allocation2] sm:$0xff] %vm19_vm0, %v110_v1  ;;  %v106_v2 = vld [vmem:[%s154_s1] sm:$0xff]  ;;  %vm86_vm3 = vcmask 779264  }
   0x2   :  { %58 = vmatpush.bf16.msra.mxu0 %v107_v0  ;;  %v94_v3 = vld [vmem:[%s155_s0] sm:$0xf]  ;;  %v105_v4 = vld [vmem:[%s155_s0] sm:$0x30]  ;;  %22 = vst.msk [vmem:[#allocation2 + $0x8] sm:$0xf] %vm21_vm2, %v110_v1 }
   0x3   :  { %v95_v5 = vor.u32 %v105_v4, %v94_v3  ;;  %v109_v10 = vld [vmem:[%s156_s2] ss:$0 sm:$0xff] }
   0x6   :  { %59 = vmatpush.bf16.msra.mxu0 %v106_v2 }
   0x8   :  { %v23_v6 = vld [vmem:[#allocation2] sm:$0xff] }
   0x9   :  { %104 = vmatmul.msk.bf16.vlgmr.msra.gmra.mxu0 %vm48_vm1, %v95_v5  ;;  %v24_v9 = vld [vmem:[#allocation2 + $0x8] sm:$0xf] }
  0x86   :  { %v61_v7 = vpop.f32.mrf.mxu0 }
  0x87   :  { %v66_v8 = vadd.f32 %v61_v7, %v23_v6 }
  0x89   :  { %69 = vst.msk [vmem:[#allocation2] sm:$0xff] %vm19_vm0, %v66_v8 }
  0x8e   :  { %v63_v11 = vpop.f32.mrf.mxu0 }
  0x8f   :  { %v67_v12 = vadd.f32 %v63_v11, %v24_v9 }
  0x90   :  { %v75_v13 = vld [vmem:[#allocation2] sm:$0xff] }
  0x91   :  { %71 = vst.msk [vmem:[#allocation2 + $0x8] sm:$0xf] %vm21_vm2, %v67_v12  ;;  %v81_v14 = vadd.f32 %v109_v10, %v75_v13 }
  0x93   :  { %v83_v15 = vpack.c.bf16 %v81_v14, %v81_v14 }
  0x95   :  { %85 = vst.msk [vmem:[%s157_s3] sm:$0xf] %vm21_vm2, %v83_v15 }
  0x98   :  { %v76_v16 = vld [vmem:[#allocation2 + $0x8] sm:$0xf] }
  0x99   :  { %v82_v17 = vadd.f32 %v109_v10, %v76_v16 }
  0x9b   :  { %v84_v18 = vpack.c.bf16 %v82_v17, %v82_v17 }
  0x9d   :  { %87 = vst.msk [vmem:[%s157_s3 + $0x4] sm:$0x3] %vm86_vm3, %v84_v18 }

// kernel: self_attention_forward.5
= control target key start
LH: loop header
LB: loop body
LE: loop exit
PB: predicated region body
PF: predicated region fallthrough
CT: control target
= control target key end

     0   :  { %vm19_vm0 = vcmask 261120   ;;  %v106_v1 = vmov 0.0   ;;  %vm21_vm1 = vcmask 257024   ;;  %s155_s1 = inlined_call_operand.vmem [shape: bf16[32,32], index: 1, kind: input, shape index: {}]   ;;  %s156_s0 = inlined_call_operand.vmem [shape: bf16[12,32], index: 0, kind: input, shape index: {}]   ;;  %s157_s2 = inlined_call_operand.vmem [shape: f32[1,32], index: 2, kind: input, shape index: {}]   ;;  %s158_s3 = inlined_call_operand.vmem [shape: f32[12,32], index: 3, kind: output, shape index: {}]  }
   0x1   :  { %v103_v0 = vld [vmem:[%s155_s1 + $0x8] sm:$0xff]  ;;  %20 = vst.msk [vmem:[#allocation2] sm:$0xff] %vm19_vm0, %v106_v1  ;;  %v102_v2 = vld [vmem:[%s155_s1] sm:$0xff] }
   0x2   :  { %58 = vmatpush.bf16.msra.mxu0 %v103_v0  ;;  %v90_v3 = vld [vmem:[%s156_s0] sm:$0xf]  ;;  %v101_v4 = vld [vmem:[%s156_s0] sm:$0x30]  ;;  %22 = vst.msk [vmem:[#allocation2 + $0x8] sm:$0xf] %vm21_vm1, %v106_v1 }
   0x3   :  { %v91_v5 = vor.u32 %v101_v4, %v90_v3  ;;  %v105_v10 = vld [vmem:[%s157_s2] ss:$0 sm:$0xff] }
   0x6   :  { %59 = vmatpush.bf16.msra.mxu0 %v102_v2 }
   0x8   :  { %v23_v6 = vld [vmem:[#allocation2] sm:$0xff] }
   0x9   :  { %100 = vmatmul.msk.bf16.vlgmr.msra.gmra.mxu0 %vm19_vm0, %v91_v5  ;;  %v24_v9 = vld [vmem:[#allocation2 + $0x8] sm:$0xf] }
  0x86   :  { %v61_v7 = vpop.f32.mrf.mxu0 }
  0x87   :  { %v66_v8 = vadd.f32 %v61_v7, %v23_v6 }
  0x89   :  { %68 = vst.msk [vmem:[#allocation2] sm:$0xff] %vm19_vm0, %v66_v8 }
  0x8e   :  { %v63_v11 = vpop.f32.mrf.mxu0 }
  0x8f   :  { %v67_v12 = vadd.f32 %v63_v11, %v24_v9 }
  0x90   :  { %v74_v13 = vld [vmem:[#allocation2] sm:$0xff] }
  0x91   :  { %70 = vst.msk [vmem:[#allocation2 + $0x8] sm:$0xf] %vm21_vm1, %v67_v12  ;;  %v80_v14 = vadd.f32 %v105_v10, %v74_v13 }
  0x93   :  { %82 = vst.msk [vmem:[%s158_s3] sm:$0xff] %vm19_vm0, %v80_v14 }
  0x98   :  { %v75_v15 = vld [vmem:[#allocation2 + $0x8] sm:$0xf] }
  0x99   :  { %v81_v16 = vadd.f32 %v105_v10, %v75_v15 }
  0x9b   :  { %83 = vst.msk [vmem:[%s158_s3 + $0x8] sm:$0xf] %vm21_vm1, %v81_v16 }

</bundles_post_ra>
